<compile_context>
chip_gen: v5e
topology: v5e:2x2
jax: 0.10.0
libtpu: 0.0.40
codegen_flags: <defaults>
</compile_context>

<pallas_src>
import functools

import jax
import jax.numpy as jnp
from jax import lax
from jax.experimental import pallas as pl
from jax.experimental.pallas import tpu as pltpu


def warp_kernel(flow_ref, src_ref, out_ref, *, H, W, IH, IW, separable):
    """One batch element, one tile of TQ output pixels.

    flow_ref : (1, 2, TQ)      flow[0] = row displacement, flow[1] = col displacement
    src_ref  : (1, C, IH*IW)   full source image (flattened spatial on lanes)
    out_ref  : (1, C, TQ)
    """
    TQ = out_ref.shape[-1]
    P = IH * IW
    q0 = pl.program_id(1) * TQ

    # Output pixel coordinates for this tile (float math; exact for < 2^24 pixels).
    lin_f = (q0 + lax.broadcasted_iota(jnp.int32, (1, TQ), 1)).astype(jnp.float32)
    row = jnp.floor(lin_f / W)          # i
    col = lin_f - row * W               # j

    flo = flow_ref[0].astype(jnp.float32)   # (2, TQ)
    y = row + flo[0:1, :]                   # row displacement
    x = col + flo[1:2, :]                   # col displacement

    # Normalize with the flow grid size, then un-normalize into src pixel coords
    # (same chain as the PyTorch module + its custom grid_sample).
    yn = 2.0 * (y / (H - 1) - 0.5)
    xn = 2.0 * (x / (W - 1) - 0.5)
    iy = (yn + 1.0) / 2.0 * (IH - 1)
    ix = (xn + 1.0) / 2.0 * (IW - 1)

    iy0 = jnp.floor(iy)
    ix0 = jnp.floor(ix)

    # Per-axis bilinear weights from the UNCLAMPED corners (matches reference:
    # weights are computed before the index clamps).
    wy0 = iy0 + 1.0 - iy      # north
    wy1 = iy - iy0            # south
    wx0 = ix0 + 1.0 - ix      # west
    wx1 = ix - ix0            # east

    # Clamp integer corner indices to the border.
    cy0 = jnp.clip(iy0, 0.0, IH - 1).astype(jnp.int32)
    cy1 = jnp.clip(iy0 + 1.0, 0.0, IH - 1).astype(jnp.int32)
    cx0 = jnp.clip(ix0, 0.0, IW - 1).astype(jnp.int32)
    cx1 = jnp.clip(ix0 + 1.0, 0.0, IW - 1).astype(jnp.int32)

    if separable:
        # Weighted row / column one-hots (small, lane-dense), then outer product.
        # Coinciding clamped corners add their weights, exactly like the
        # reference's repeated gathers.
        r_iota = lax.broadcasted_iota(jnp.int32, (IH, TQ), 0)
        c_iota = lax.broadcasted_iota(jnp.int32, (IW, TQ), 0)
        rw = (jnp.where(r_iota == cy0, wy0, 0.0)
              + jnp.where(r_iota == cy1, wy1, 0.0))            # (IH, TQ)
        cw = (jnp.where(c_iota == cx0, wx0, 0.0)
              + jnp.where(c_iota == cx1, wx1, 0.0))            # (IW, TQ)
        # (IH, IW, TQ) -> (P, TQ): lane dim untouched, IW % 8 == 0 so the merge
        # is sublane-tile aligned (no relayout).
        m = (rw[:, None, :] * cw[None, :, :]).reshape(P, TQ)
    else:
        # Fallback: compare the 4 clamped linear tap indices directly.
        pix = lax.broadcasted_iota(jnp.int32, (P, TQ), 0)
        m = (jnp.where(pix == cy0 * IW + cx0, wy0 * wx0, 0.0)
             + jnp.where(pix == cy0 * IW + cx1, wy0 * wx1, 0.0)
             + jnp.where(pix == cy1 * IW + cx0, wy1 * wx0, 0.0)
             + jnp.where(pix == cy1 * IW + cx1, wy1 * wx1, 0.0))

    src = src_ref[0].astype(jnp.float32)                          # (C, P)
    out = jnp.dot(src, m, preferred_element_type=jnp.float32)     # (C, TQ) on MXU
    out_ref[...] = out[None].astype(out_ref.dtype)


@jax.jit
def transformer_2d(src, flow):
    """src: (B, C, IH, IW); flow: (B, 2, H, W) -> warped (B, C, H, W)."""
    B, C, IH, IW = src.shape
    _, _, H, W = flow.shape
    HW = H * W
    P = IH * IW

    # Lane-dense pixel tile: largest multiple of 128 that divides HW while the
    # (P, TQ) selection matrix stays comfortably inside VMEM.
    TQ = HW
    for cand in (512, 256, 128):
        if HW % cand == 0 and P * cand * 4 <= 8 * 1024 * 1024:
            TQ = cand
            break

    src_flat = src.reshape(B, C, P)       # contiguous reshapes, no transpose
    flow_flat = flow.reshape(B, 2, HW)

    kernel = functools.partial(warp_kernel, H=H, W=W, IH=IH, IW=IW,
                               separable=(IW % 8 == 0))

    out_flat = pl.pallas_call(
        kernel,
        out_shape=jax.ShapeDtypeStruct((B, C, HW), src.dtype),
        grid_spec=pltpu.PrefetchScalarGridSpec(
            num_scalar_prefetch=0,
            grid=(B, HW // TQ),
            in_specs=[
                pl.BlockSpec((1, 2, TQ), lambda b, q: (b, 0, q)),
                pl.BlockSpec((1, C, P), lambda b, q: (b, 0, 0)),   # src resident across q
            ],
            out_specs=pl.BlockSpec((1, C, TQ), lambda b, q: (b, 0, q)),
        ),
        compiler_params=pltpu.CompilerParams(
            dimension_semantics=("parallel", "parallel")),
    )(flow_flat, src_flat)

    return out_flat.reshape(B, C, H, W)


def _reference(src, flow):
    """Pure-JAX transcription of the PyTorch Transformer_2D + custom grid_sample."""
    B, C, IH, IW = src.shape
    _, _, H, W = flow.shape
    gy, gx = jnp.meshgrid(jnp.arange(H, dtype=jnp.float32),
                          jnp.arange(W, dtype=jnp.float32), indexing="ij")
    y = gy[None] + flow[:, 0]
    x = gx[None] + flow[:, 1]
    yn = 2.0 * (y / (H - 1) - 0.5)
    xn = 2.0 * (x / (W - 1) - 0.5)
    iy = (yn + 1.0) / 2.0 * (IH - 1)
    ix = (xn + 1.0) / 2.0 * (IW - 1)

    ix0 = jnp.floor(ix)
    iy0 = jnp.floor(iy)
    w_nw = (ix0 + 1.0 - ix) * (iy0 + 1.0 - iy)
    w_ne = (ix - ix0) * (iy0 + 1.0 - iy)
    w_sw = (ix0 + 1.0 - ix) * (iy - iy0)
    w_se = (ix - ix0) * (iy - iy0)

    cx0 = jnp.clip(ix0, 0, IW - 1).astype(jnp.int32)
    cx1 = jnp.clip(ix0 + 1.0, 0, IW - 1).astype(jnp.int32)
    cy0 = jnp.clip(iy0, 0, IH - 1).astype(jnp.int32)
    cy1 = jnp.clip(iy0 + 1.0, 0, IH - 1).astype(jnp.int32)

    src_flat = src.reshape(B, C, IH * IW)

    def gather(cy, cx):
        idx = (cy * IW + cx).reshape(B, 1, H * W)
        idx = jnp.broadcast_to(idx, (B, C, H * W))
        return jnp.take_along_axis(src_flat, idx, axis=2).reshape(B, C, H, W)

    out = (gather(cy0, cx0) * w_nw[:, None]
           + gather(cy0, cx1) * w_ne[:, None]
           + gather(cy1, cx0) * w_sw[:, None]
           + gather(cy1, cx1) * w_se[:, None])
    return out


if __name__ == "__main__":
    B, C, H, W = 2, 4, 16, 16
    key = jax.random.PRNGKey(0)
    ks, kf = jax.random.split(key)

    src = jax.random.normal(ks, (B, C, H, W), jnp.float32)
    # Scale flow so some samples land outside the image -> exercises border clamping.
    flow = jax.random.normal(kf, (B, 2, H, W), jnp.float32) * 3.0

    out = jax.block_until_ready(transformer_2d(src, flow))
    ref = jax.block_until_ready(_reference(src, flow))

    assert out.shape == (B, C, H, W)
    err = float(jnp.max(jnp.abs(out - ref)))
    assert err < 1e-4, f"mismatch vs reference: max abs err {err}"

    print("KERNEL_OK")
</pallas_src>

<mosaic_0001>
module attributes {stable_mosaic.version = 11 : i64} {
  func.func @warp_kernel(%arg0: i32, %arg1: i32, %arg2: memref<1x2x256xf32, #tpu.memory_space<vmem>>, %arg3: memref<1x4x256xf32, #tpu.memory_space<vmem>>, %arg4: memref<1x4x256xf32, #tpu.memory_space<vmem>>) attributes {dimension_semantics = [#tpu.dimension_semantics<parallel>, #tpu.dimension_semantics<parallel>], iteration_bounds = array<i64: 2, 1>, scalar_prefetch = 0 : i64, scratch_operands = 0 : i64, tpu.core_type = #tpu.core_type<tc>, window_params = [{transform_indices = @transform_0, window_bounds = array<i64: 1, 2, 256>}, {transform_indices = @transform_1, window_bounds = array<i64: 1, 4, 256>}, {transform_indices = @transform_2, window_bounds = array<i64: 1, 4, 256>}]} {
    %c256_i32 = arith.constant 256 : i32
    %0 = arith.muli %arg1, %c256_i32 : i32
    %1 = tpu.iota {dimensions = array<i32: 1>} : vector<1x256xi32>
    %2 = vector.broadcast %0 : i32 to vector<1x256xi32>
    %3 = arith.addi %2, %1 : vector<1x256xi32>
    %4 = arith.sitofp %3 : vector<1x256xi32> to vector<1x256xf32>
    %cst = arith.constant 1.600000e+01 : f32
    %5 = vector.broadcast %cst : f32 to vector<1x256xf32>
    %6 = arith.divf %4, %5 : vector<1x256xf32>
    %7 = math.floor %6 : vector<1x256xf32>
    %cst_0 = arith.constant 1.600000e+01 : f32
    %8 = vector.broadcast %cst_0 : f32 to vector<1x256xf32>
    %9 = arith.mulf %7, %8 : vector<1x256xf32>
    %10 = arith.subf %4, %9 : vector<1x256xf32>
    %c0 = arith.constant 0 : index
    %c0_1 = arith.constant 0 : index
    %c0_2 = arith.constant 0 : index
    %11 = vector.load %arg2[%c0, %c0_1, %c0_2] : memref<1x2x256xf32, #tpu.memory_space<vmem>>, vector<1x2x256xf32>
    %12 = vector.shape_cast %11 : vector<1x2x256xf32> to vector<2x256xf32>
    %13 = vector.extract_strided_slice %12 {offsets = [0, 0], sizes = [1, 256], strides = [1, 1]} : vector<2x256xf32> to vector<1x256xf32>
    %14 = arith.addf %7, %13 : vector<1x256xf32>
    %15 = vector.extract_strided_slice %12 {offsets = [1, 0], sizes = [1, 256], strides = [1, 1]} : vector<2x256xf32> to vector<1x256xf32>
    %16 = arith.addf %10, %15 : vector<1x256xf32>
    %cst_3 = arith.constant 1.500000e+01 : f32
    %17 = vector.broadcast %cst_3 : f32 to vector<1x256xf32>
    %18 = arith.divf %14, %17 : vector<1x256xf32>
    %cst_4 = arith.constant 5.000000e-01 : f32
    %19 = vector.broadcast %cst_4 : f32 to vector<1x256xf32>
    %20 = arith.subf %18, %19 : vector<1x256xf32>
    %cst_5 = arith.constant 2.000000e+00 : f32
    %21 = vector.broadcast %cst_5 : f32 to vector<1x256xf32>
    %22 = arith.mulf %21, %20 : vector<1x256xf32>
    %cst_6 = arith.constant 1.500000e+01 : f32
    %23 = vector.broadcast %cst_6 : f32 to vector<1x256xf32>
    %24 = arith.divf %16, %23 : vector<1x256xf32>
    %cst_7 = arith.constant 5.000000e-01 : f32
    %25 = vector.broadcast %cst_7 : f32 to vector<1x256xf32>
    %26 = arith.subf %24, %25 : vector<1x256xf32>
    %cst_8 = arith.constant 2.000000e+00 : f32
    %27 = vector.broadcast %cst_8 : f32 to vector<1x256xf32>
    %28 = arith.mulf %27, %26 : vector<1x256xf32>
    %cst_9 = arith.constant 1.000000e+00 : f32
    %29 = vector.broadcast %cst_9 : f32 to vector<1x256xf32>
    %30 = arith.addf %22, %29 : vector<1x256xf32>
    %cst_10 = arith.constant 2.000000e+00 : f32
    %31 = vector.broadcast %cst_10 : f32 to vector<1x256xf32>
    %32 = arith.divf %30, %31 : vector<1x256xf32>
    %cst_11 = arith.constant 1.500000e+01 : f32
    %33 = vector.broadcast %cst_11 : f32 to vector<1x256xf32>
    %34 = arith.mulf %32, %33 : vector<1x256xf32>
    %cst_12 = arith.constant 1.000000e+00 : f32
    %35 = vector.broadcast %cst_12 : f32 to vector<1x256xf32>
    %36 = arith.addf %28, %35 : vector<1x256xf32>
    %cst_13 = arith.constant 2.000000e+00 : f32
    %37 = vector.broadcast %cst_13 : f32 to vector<1x256xf32>
    %38 = arith.divf %36, %37 : vector<1x256xf32>
    %cst_14 = arith.constant 1.500000e+01 : f32
    %39 = vector.broadcast %cst_14 : f32 to vector<1x256xf32>
    %40 = arith.mulf %38, %39 : vector<1x256xf32>
    %41 = math.floor %34 : vector<1x256xf32>
    %42 = math.floor %40 : vector<1x256xf32>
    %cst_15 = arith.constant 1.000000e+00 : f32
    %43 = vector.broadcast %cst_15 : f32 to vector<1x256xf32>
    %44 = arith.addf %41, %43 : vector<1x256xf32>
    %45 = arith.subf %44, %34 : vector<1x256xf32>
    %46 = arith.subf %34, %41 : vector<1x256xf32>
    %cst_16 = arith.constant 1.000000e+00 : f32
    %47 = vector.broadcast %cst_16 : f32 to vector<1x256xf32>
    %48 = arith.addf %42, %47 : vector<1x256xf32>
    %49 = arith.subf %48, %40 : vector<1x256xf32>
    %50 = arith.subf %40, %42 : vector<1x256xf32>
    %cst_17 = arith.constant 0.000000e+00 : f32
    %c15_i32 = arith.constant 15 : i32
    %51 = vector.broadcast %cst_17 : f32 to vector<1x256xf32>
    %52 = arith.maximumf %51, %41 : vector<1x256xf32>
    %53 = arith.sitofp %c15_i32 : i32 to f32
    %54 = vector.broadcast %53 : f32 to vector<1x256xf32>
    %55 = arith.minimumf %54, %52 : vector<1x256xf32>
    %56 = arith.fptosi %55 : vector<1x256xf32> to vector<1x256xi32>
    %cst_18 = arith.constant 1.000000e+00 : f32
    %57 = vector.broadcast %cst_18 : f32 to vector<1x256xf32>
    %58 = arith.addf %41, %57 : vector<1x256xf32>
    %cst_19 = arith.constant 0.000000e+00 : f32
    %c15_i32_20 = arith.constant 15 : i32
    %59 = vector.broadcast %cst_19 : f32 to vector<1x256xf32>
    %60 = arith.maximumf %59, %58 : vector<1x256xf32>
    %61 = arith.sitofp %c15_i32_20 : i32 to f32
    %62 = vector.broadcast %61 : f32 to vector<1x256xf32>
    %63 = arith.minimumf %62, %60 : vector<1x256xf32>
    %64 = arith.fptosi %63 : vector<1x256xf32> to vector<1x256xi32>
    %cst_21 = arith.constant 0.000000e+00 : f32
    %c15_i32_22 = arith.constant 15 : i32
    %65 = vector.broadcast %cst_21 : f32 to vector<1x256xf32>
    %66 = arith.maximumf %65, %42 : vector<1x256xf32>
    %67 = arith.sitofp %c15_i32_22 : i32 to f32
    %68 = vector.broadcast %67 : f32 to vector<1x256xf32>
    %69 = arith.minimumf %68, %66 : vector<1x256xf32>
    %70 = arith.fptosi %69 : vector<1x256xf32> to vector<1x256xi32>
    %cst_23 = arith.constant 1.000000e+00 : f32
    %71 = vector.broadcast %cst_23 : f32 to vector<1x256xf32>
    %72 = arith.addf %42, %71 : vector<1x256xf32>
    %cst_24 = arith.constant 0.000000e+00 : f32
    %c15_i32_25 = arith.constant 15 : i32
    %73 = vector.broadcast %cst_24 : f32 to vector<1x256xf32>
    %74 = arith.maximumf %73, %72 : vector<1x256xf32>
    %75 = arith.sitofp %c15_i32_25 : i32 to f32
    %76 = vector.broadcast %75 : f32 to vector<1x256xf32>
    %77 = arith.minimumf %76, %74 : vector<1x256xf32>
    %78 = arith.fptosi %77 : vector<1x256xf32> to vector<1x256xi32>
    %79 = tpu.iota {dimensions = array<i32: 0>} : vector<16x256xi32>
    %80 = tpu.iota {dimensions = array<i32: 0>} : vector<16x256xi32>
    %81 = vector.broadcast %56 : vector<1x256xi32> to vector<16x256xi32>
    %82 = arith.cmpi eq, %79, %81 : vector<16x256xi32>
    %cst_26 = arith.constant 0.000000e+00 : f32
    %83 = vector.shape_cast %45 : vector<1x256xf32> to vector<1x256xf32>
    %84 = vector.broadcast %83 : vector<1x256xf32> to vector<16x256xf32>
    %85 = vector.broadcast %cst_26 : f32 to vector<16x256xf32>
    %86 = arith.select %82, %84, %85 : vector<16x256xi1>, vector<16x256xf32>
    %87 = vector.broadcast %64 : vector<1x256xi32> to vector<16x256xi32>
    %88 = arith.cmpi eq, %79, %87 : vector<16x256xi32>
    %cst_27 = arith.constant 0.000000e+00 : f32
    %89 = vector.shape_cast %46 : vector<1x256xf32> to vector<1x256xf32>
    %90 = vector.broadcast %89 : vector<1x256xf32> to vector<16x256xf32>
    %91 = vector.broadcast %cst_27 : f32 to vector<16x256xf32>
    %92 = arith.select %88, %90, %91 : vector<16x256xi1>, vector<16x256xf32>
    %93 = arith.addf %86, %92 : vector<16x256xf32>
    %94 = vector.broadcast %70 : vector<1x256xi32> to vector<16x256xi32>
    %95 = arith.cmpi eq, %80, %94 : vector<16x256xi32>
    %cst_28 = arith.constant 0.000000e+00 : f32
    %96 = vector.shape_cast %49 : vector<1x256xf32> to vector<1x256xf32>
    %97 = vector.broadcast %96 : vector<1x256xf32> to vector<16x256xf32>
    %98 = vector.broadcast %cst_28 : f32 to vector<16x256xf32>
    %99 = arith.select %95, %97, %98 : vector<16x256xi1>, vector<16x256xf32>
    %100 = vector.broadcast %78 : vector<1x256xi32> to vector<16x256xi32>
    %101 = arith.cmpi eq, %80, %100 : vector<16x256xi32>
    %cst_29 = arith.constant 0.000000e+00 : f32
    %102 = vector.shape_cast %50 : vector<1x256xf32> to vector<1x256xf32>
    %103 = vector.broadcast %102 : vector<1x256xf32> to vector<16x256xf32>
    %104 = vector.broadcast %cst_29 : f32 to vector<16x256xf32>
    %105 = arith.select %101, %103, %104 : vector<16x256xi1>, vector<16x256xf32>
    %106 = arith.addf %99, %105 : vector<16x256xf32>
    %107 = vector.shape_cast %93 : vector<16x256xf32> to vector<16x1x256xf32>
    %108 = vector.shape_cast %106 : vector<16x256xf32> to vector<1x16x256xf32>
    %109 = vector.broadcast %107 : vector<16x1x256xf32> to vector<16x16x256xf32>
    %110 = vector.broadcast %108 : vector<1x16x256xf32> to vector<16x16x256xf32>
    %111 = arith.mulf %109, %110 : vector<16x16x256xf32>
    %112 = vector.shape_cast %111 : vector<16x16x256xf32> to vector<256x256xf32>
    %c0_30 = arith.constant 0 : index
    %c0_31 = arith.constant 0 : index
    %c0_32 = arith.constant 0 : index
    %113 = vector.load %arg3[%c0_30, %c0_31, %c0_32] : memref<1x4x256xf32, #tpu.memory_space<vmem>>, vector<1x4x256xf32>
    %114 = vector.shape_cast %113 : vector<1x4x256xf32> to vector<4x256xf32>
    %cst_33 = arith.constant dense<0.000000e+00> : vector<4x256xf32>
    %115 = tpu.matmul %114, %112, %cst_33 {dimension_numbers = #tpu.dot_dimension_numbers<[1], [0], [0], [1], [0, 0, 1, 1], [], []>} : vector<4x256xf32>, vector<256x256xf32>, vector<4x256xf32> -> vector<4x256xf32>
    %116 = vector.shape_cast %115 : vector<4x256xf32> to vector<1x4x256xf32>
    %c0_34 = arith.constant 0 : index
    %c0_35 = arith.constant 0 : index
    %c0_36 = arith.constant 0 : index
    %117 = vector.load %arg4[%c0_34, %c0_35, %c0_36] : memref<1x4x256xf32, #tpu.memory_space<vmem>>, vector<1x4x256xf32>
    tpu.vector_store %arg4[%c0_34, %c0_35, %c0_36], %116 {strides = array<i32>} : memref<1x4x256xf32, #tpu.memory_space<vmem>>, vector<1x4x256xf32>,
    return
  }
  func.func @transform_0(%arg0: i32, %arg1: i32) -> (i32, i32, i32) {
    %c0_i32 = arith.constant 0 : i32
    %c0_i32_0 = arith.constant 0 : i32
    return %arg0, %c0_i32, %arg1 : i32, i32, i32
  }
  func.func @transform_1(%arg0: i32, %arg1: i32) -> (i32, i32, i32) {
    %c0_i32 = arith.constant 0 : i32
    %c0_i32_0 = arith.constant 0 : i32
    %c0_i32_1 = arith.constant 0 : i32
    return %arg0, %c0_i32, %c0_i32_0 : i32, i32, i32
  }
  func.func @transform_2(%arg0: i32, %arg1: i32) -> (i32, i32, i32) {
    %c0_i32 = arith.constant 0 : i32
    %c0_i32_0 = arith.constant 0 : i32
    return %arg0, %c0_i32, %arg1 : i32, i32, i32
  }
}

</mosaic_0001>

<bundles_post_ra>
// kernel: transformer_2d.1
= control target key start
LH: loop header
LB: loop body
LE: loop exit
PB: predicated region body
PF: predicated region fallthrough
CT: control target
= control target key end

     0   :  { %s866_s9 = smov 0   ;;  %s868_s10 = smov 0   ;;  %s1128_s0 = inlined_call_operand.vmem [shape: f32[2,2,256], index: 0, kind: input, shape index: {}]   ;;  %s1129_s1 = inlined_call_operand.vmem [shape: f32[2,4,256], index: 1, kind: input, shape index: {}]   ;;  %s1130_s2 = inlined_call_operand.vmem [shape: f32[2,4,256], index: 2, kind: output, shape index: {}]  }
   0x1   :  { %s870_s11 = smov 0  }
   0x2 LB: > { %s24_s12 = sadd.s32 1, %s842_s10  ;;  %p747_p0 = scmp.ge.s32.totalorder %s846_s11, 1  ;;  %s846_s11 = sphi %s870_s11, %s12_s11   ;;  %s842_s10 = sphi %s868_s10, %s1132_s10   ;;  %s838_s9 = sphi %s866_s9, %s1131_s9  }
   0x3   : > { %p26_p1 = scmp.ge.s32.totalorder %s24_s12, 2  ;;  %p143_p2 = scmp.lt.s32.totalorder %s846_s11, 3 }
   0x5   : > { %s1134_s12 = smov (%p26_p1, %s24_s12), 0  ;;  %p144_p3 = pnand %p747_p0, %p143_p2 }
   0x6   : > { %p179_p4 = scmp.lt.s32.totalorder (!%p144_p3), %s838_s9, 1 }
   0x7   : > { %147 = sbr.rel (%p144_p3) target bundleno = 258 (0x102), region = 28 }
   0xc   : > { %v204_v0 = vlaneseq  ;;  %v848_v1 = vmov 16.0   ;;  %v849_v2 = vmov 15.0   ;;  %v850_v3 = vmov 2.0   ;;  %s1136_s9 = smov (!%p179_p4, %s838_s9), 1 }
   0xd   : > { %818 = vrcp.f32 %v848_v1  ;;  %s760_s13 = sshll.u32 %s1136_s9, 2  ;;  %vm404_vm10 = vcmask 1046528   ;;  %s761_s17 = sshll.u32 %s1136_s9, 3 }
   0xe   : > { %820 = vrcp.f32 %v849_v2  ;;  %v205_v4 = vand.u32 127, %v204_v0  ;;  %s186_s16 = scalar_lea.vmem %s1128_s0, %s760_s13  ;;  %v892_v59 = vshrl.u32 %v204_v0, 7  ;;  %s192_s20 = scalar_lea.vmem %s1129_s1, %s761_s17 }
   0xf   : > { %822 = vrcp.f32 %v850_v3  ;;  %v227_v19 = vld [vmem:[%s186_s16] sm:$0xf]  ;;  %s201_s23 = scalar_lea.vmem %s1130_s2, %s761_s17 }
  0x10   : > { %v206_v9 = vadd.s32 128, %v205_v4  ;;  %v210_v15 = vcvt.s32.f32 %v205_v4  ;;  %v229_v21 = vperm.slane %v227_v19, 0  ;;  %v230_v26 = vperm.slane %v227_v19, 2 }
  0x11   : > { %v235_v29 = vperm.slane %v227_v19, 1  ;;  %v236_v30 = vperm.slane %v227_v19, 3 }
  0x12   : > { %v211_v16 = vcvt.s32.f32 %v206_v9 }
  0x13   : > { %v819_v5 = vpop.eup %818 }
  0x14   : > { %v821_v6 = vpop.eup %820  ;;  %v213_v7 = vmul.f32 16.0, %v819_v5  ;;  %vm217_vm0 = vweird.f32 %v819_v5 }
  0x15   : > { %v823_v8 = vpop.eup %822  ;;  %v242_v10 = vmul.f32 15.0, %v821_v6  ;;  %vm246_vm1 = vweird.f32 %v821_v6 }
  0x16   : > { %v214_v11 = vsub.f32 1.0, %v213_v7  ;;  %v263_v14 = vmul.f32 2.0, %v823_v8  ;;  %vm267_vm2 = vweird.f32 %v823_v8 }
  0x17   : > { %v243_v12 = vsub.f32 1.0, %v242_v10 }
  0x18   : > { %v215_v13 = vmul.f32 %v819_v5, %v214_v11  ;;  %v264_v23 = vsub.f32 1.0, %v263_v14 }
  0x19   : > { %v244_v17 = vmul.f32 %v821_v6, %v243_v12 }
  0x1a   : > { %v216_v18 = vadd.f32 %v819_v5, %v215_v13  ;;  %v265_v32 = vmul.f32 %v823_v8, %v264_v23 }
  0x1b   : > { %v245_v22 = vadd.f32 %v821_v6, %v244_v17 }
  0x1c   : > { %v218_v20 = vsel %vm217_vm0, %v819_v5, %v216_v18  ;;  %v266_v41 = vadd.f32 %v823_v8, %v265_v32  ;;  %v905_v5 = vadd.s32 8, %v892_v59 }
  0x1d   : > { %v219_v24 = vmul.f32 %v218_v20, %v210_v15  ;;  %v220_v25 = vmul.f32 %v218_v20, %v211_v16  ;;  %v247_v31 = vsel %vm246_vm1, %v821_v6, %v245_v22 }
  0x1e   : > { %v268_v50 = vsel %vm267_vm2, %v823_v8, %v266_v41 }
  0x1f   : > { %v221_v27 = vfloor.f32 %v219_v24  ;;  %v222_v28 = vfloor.f32 %v220_v25 }
  0x21   : > { %v223_v33 = vmul.f32 16.0, %v221_v27  ;;  %v224_v34 = vmul.f32 16.0, %v222_v28  ;;  %v233_v35 = vadd.f32 %v229_v21, %v221_v27  ;;  %v234_v36 = vadd.f32 %v230_v26, %v222_v28 }
  0x23   : > { %v225_v37 = vsub.f32 %v210_v15, %v223_v33  ;;  %v226_v38 = vsub.f32 %v211_v16, %v224_v34  ;;  %v248_v39 = vmul.f32 %v247_v31, %v233_v35  ;;  %v249_v40 = vmul.f32 %v247_v31, %v234_v36 }
  0x25   : > { %v239_v42 = vadd.f32 %v235_v29, %v225_v37  ;;  %v240_v43 = vadd.f32 %v236_v30, %v226_v38  ;;  %v754_v44 = vadd.f32 -0.5, %v248_v39  ;;  %v755_v45 = vadd.f32 -0.5, %v249_v40 }
  0x27   : > { %v252_v46 = vmul.f32 2.0, %v754_v44  ;;  %v253_v47 = vmul.f32 2.0, %v755_v45  ;;  %v254_v48 = vmul.f32 %v247_v31, %v239_v42  ;;  %v255_v49 = vmul.f32 %v247_v31, %v240_v43 }
  0x29   : > { %v756_v51 = vadd.f32 -0.5, %v254_v48  ;;  %v757_v52 = vadd.f32 -0.5, %v255_v49  ;;  %v260_v53 = vadd.f32 1.0, %v252_v46  ;;  %v261_v54 = vadd.f32 1.0, %v253_v47 }
  0x2b   : > { %v258_v55 = vmul.f32 2.0, %v756_v51  ;;  %v259_v56 = vmul.f32 2.0, %v757_v52  ;;  %v269_v57 = vmul.f32 %v268_v50, %v260_v53  ;;  %v270_v58 = vmul.f32 %v268_v50, %v261_v54 }
  0x2d   : > { %v894_v60 = vmul.f32 15.0, %v269_v57  ;;  %v896_v61 = vmul.f32 15.0, %v270_v58  ;;  %v273_v62 = vadd.f32 1.0, %v258_v55  ;;  %v274_v63 = vadd.f32 1.0, %v259_v56 }
  0x2f   : > { %v275_v1 = vmul.f32 %v273_v62, %v268_v50  ;;  %v276_v2 = vmul.f32 %v274_v63, %v268_v50  ;;  %v899_v3 = vfloor.f32 %v894_v60  ;;  %v902_v4 = vfloor.f32 %v896_v61 }
  0x31   : > { %v907_v6 = vmul.f32 15.0, %v275_v1  ;;  %v909_v0 = vmul.f32 15.0, %v276_v2  ;;  %v283_v7 = vadd.f32 1.0, %v899_v3  ;;  %v284_v8 = vadd.f32 1.0, %v902_v4 }
  0x32   : > { %v287_v9 = vsub.f32 %v894_v60, %v899_v3  ;;  %v288_v10 = vsub.f32 %v896_v61, %v902_v4  ;;  %v295_v11 = vmax.f32 %v899_v3, 0.0  ;;  %v296_v12 = vmax.f32 %v902_v4, 0.0 }
  0x33   : > { %v920_v13 = vfloor.f32 %v907_v6  ;;  %v923_v14 = vfloor.f32 %v909_v0  ;;  %v285_v15 = vsub.f32 %v283_v7, %v894_v60  ;;  %v286_v16 = vsub.f32 %v284_v8, %v896_v61 }
  0x34   : > { %v297_v17 = vmin.f32 %v295_v11, 15.0  ;;  %v298_v18 = vmin.f32 %v296_v12, 15.0  ;;  %v301_v19 = vmax.f32 %v283_v7, 0.0  ;;  %v302_v20 = vmax.f32 %v284_v8, 0.0 }
  0x35   : > { %v289_v21 = vadd.f32 1.0, %v920_v13  ;;  %v290_v22 = vadd.f32 1.0, %v923_v14  ;;  %v293_v23 = vsub.f32 %v907_v6, %v920_v13  ;;  %v294_v24 = vsub.f32 %v909_v0, %v923_v14 }
  0x36   : > { %v764_v25 = vcvt.f32.s32 %v297_v17  ;;  %v766_v26 = vcvt.f32.s32 %v298_v18  ;;  %v303_v27 = vmin.f32 %v301_v19, 15.0  ;;  %v304_v28 = vmin.f32 %v302_v20, 15.0 }
  0x37   : > { %v291_v29 = vsub.f32 %v289_v21, %v907_v6  ;;  %v292_v30 = vsub.f32 %v290_v22, %v909_v0  ;;  %v307_v31 = vmax.f32 %v920_v13, 0.0  ;;  %v308_v32 = vmax.f32 %v923_v14, 0.0 }
  0x38   : > { %vm767_vm3 = vcmp.lt.s32.totalorder %v303_v27, 0  ;;  %v768_v33 = vceil.f32 %v303_v27  ;;  %v769_v34 = vfloor.f32 %v303_v27  ;;  %vm772_vm4 = vcmp.lt.s32.totalorder %v304_v28, 0 }
  0x39   : > { %v773_v35 = vceil.f32 %v304_v28  ;;  %v774_v36 = vfloor.f32 %v304_v28  ;;  %v309_v37 = vmin.f32 %v307_v31, 15.0  ;;  %v310_v38 = vmin.f32 %v308_v32, 15.0 }
  0x3a   : > { %v770_v39 = vsel %vm767_vm3, %v768_v33, %v769_v34  ;;  %v313_v40 = vmax.f32 %v289_v21, 0.0  ;;  %v314_v41 = vmax.f32 %v290_v22, 0.0  ;;  %v937_v42 = vperm.slane %v764_v25, 0 }
  0x3b   : > { %v771_v43 = vcvt.f32.s32 %v770_v39  ;;  %v775_v44 = vsel %vm772_vm4, %v773_v35, %v774_v36  ;;  %v778_v45 = vcvt.f32.s32 %v309_v37  ;;  %v780_v46 = vcvt.f32.s32 %v310_v38 }
  0x3c   : > { %v776_v47 = vcvt.f32.s32 %v775_v44  ;;  %v315_v48 = vmin.f32 %v313_v40, 15.0  ;;  %v316_v49 = vmin.f32 %v314_v41, 15.0  ;;  %v939_v50 = vperm.slane %v766_v26, 0  ;;  %v550_v41 = vld [vmem:[%s192_s20] sm:$0xff] }
  0x3d   : > { %vm324_vm5 = vcmp.eq.s32.totalorder %v892_v59, %v937_v42  ;;  %v328_v51 = vperm.slane %v285_v15, 0  ;;  %v329_v52 = vperm.slane %v286_v16, 0  ;;  %v943_v53 = vperm.slane %v771_v43, 0  ;;  %552 = vst [vmem:[#allocation1] ss:$2 sm:$0xff] %v550_v41 }
  0x3e   : > { %vm781_vm6 = vcmp.lt.s32.totalorder %v315_v48, 0  ;;  %v782_v54 = vceil.f32 %v315_v48  ;;  %v783_v55 = vfloor.f32 %v315_v48  ;;  %vm786_vm7 = vcmp.lt.s32.totalorder %v316_v49, 0 }
  0x3f   : > { %v787_v56 = vceil.f32 %v316_v49  ;;  %v788_v57 = vfloor.f32 %v316_v49  ;;  %vm325_vm8 = vcmp.eq.s32.totalorder %v892_v59, %v939_v50  ;;  %v330_v58 = vsel %vm324_vm5, %v328_v51, 0.0 }
  0x40   : > { %v784_v62 = vsel %vm781_vm6, %v782_v54, %v783_v55  ;;  %v331_v63 = vsel %vm325_vm8, %v329_v52, 0.0  ;;  %v335_v1 = vperm.slane %v776_v47, 0  ;;  %vm336_vm9 = vcmp.eq.s32.totalorder %v892_v59, %v943_v53 }
  0x41   : > { %v785_v2 = vcvt.f32.s32 %v784_v62  ;;  %v789_v7 = vsel %vm786_vm7, %v787_v56, %v788_v57  ;;  %v340_v8 = vperm.slane %v287_v9, 0  ;;  %v341_v11 = vperm.slane %v288_v10, 0 }
  0x42   : > { %v790_v12 = vcvt.f32.s32 %v789_v7  ;;  %vm337_vm11 = vcmp.eq.s32.totalorder %v892_v59, %v335_v1  ;;  %v350_v15 = vperm.slane %v778_v45, 0  ;;  %v351_v16 = vperm.slane %v780_v46, 0 }
  0x43   : > { %v342_v17 = vsel %vm336_vm9, %v340_v8, 0.0  ;;  %v343_v18 = vsel %vm337_vm11, %v341_v11, 0.0  ;;  %v356_v19 = vperm.slane %v291_v29, 0  ;;  %v357_v20 = vperm.slane %v292_v30, 0 }
  0x44   : > { %v956_v21 = vadd.f32 %v342_v17, %v330_v58  ;;  %v347_v22 = vadd.f32 %v343_v18, %v331_v63  ;;  %vm352_vm12 = vcmp.eq.s32.totalorder %v892_v59, %v350_v15  ;;  %vm353_vm13 = vcmp.eq.s32.totalorder %v892_v59, %v351_v16 }
  0x45   : > { %vm354_vm14 = vcmp.eq.s32.totalorder %v905_v5, %v350_v15  ;;  %vm355_vm15 = vcmp.eq.s32.totalorder %v905_v5, %v351_v16  ;;  %v358_v60 = vsel %vm352_vm12, %v356_v19, 0.0  ;;  %v359_v61 = vsel %vm353_vm13, %v357_v20, 0.0 }
  0x46   : > { %v360_v3 = vsel %vm354_vm14, %v356_v19, 0.0  ;;  %v361_v4 = vsel %vm355_vm15, %v357_v20, 0.0  ;;  %v362_v9 = vperm.slane %v785_v2, 0  ;;  %v363_v10 = vperm.slane %v790_v12, 0 }
  0x47   : > { %v368_v25 = vperm.slane %v293_v23, 0  ;;  %v369_v26 = vperm.slane %v294_v24, 0  ;;  %v968_v27 = vrot.slane %v347_v22, 7  ;;  %vm326_vm0 = vcmp.eq.s32.totalorder %v905_v5, %v937_v42 }
  0x48   : > { %vm364_vm1 = vcmp.eq.s32.totalorder %v892_v59, %v362_v9  ;;  %vm365_vm2 = vcmp.eq.s32.totalorder %v892_v59, %v363_v10  ;;  %vm366_vm3 = vcmp.eq.s32.totalorder %v905_v5, %v362_v9  ;;  %vm367_vm4 = vcmp.eq.s32.totalorder %v905_v5, %v363_v10 }
  0x49   : > { %v370_v28 = vsel %vm364_vm1, %v368_v25, 0.0  ;;  %v371_v6 = vsel %vm365_vm2, %v369_v26, 0.0  ;;  %v372_v13 = vsel %vm366_vm3, %v368_v25, 0.0  ;;  %v373_v23 = vsel %vm367_vm4, %v369_v26, 0.0 }
  0x4a   : > { %v977_v0 = vadd.f32 %v370_v28, %v358_v60  ;;  %v979_v14 = vadd.f32 %v371_v6, %v359_v61  ;;  %v981_v24 = vadd.f32 %v372_v13, %v360_v3  ;;  %v983_v29 = vadd.f32 %v373_v23, %v361_v4 }
  0x4b   : > { %v405_v59 = vsel %vm404_vm10, %v968_v27, %v956_v21  ;;  %vm327_vm5 = vcmp.eq.s32.totalorder %v905_v5, %v939_v50  ;;  %v332_v30 = vsel %vm326_vm0, %v328_v51, 0.0  ;;  %vm338_vm6 = vcmp.eq.s32.totalorder %v905_v5, %v943_v53 }
  0x4c   : > { %v406_v31 = vrot.slane %v405_v59, 7  ;;  %v333_v32 = vsel %vm327_vm5, %v329_v52, 0.0  ;;  %vm339_vm7 = vcmp.eq.s32.totalorder %v905_v5, %v335_v1  ;;  %v344_v33 = vsel %vm338_vm6, %v340_v8, 0.0 }
  0x4d   : > { %v345_v34 = vsel %vm339_vm7, %v341_v11, 0.0  ;;  %v1001_v35 = vadd.f32 %v344_v33, %v332_v30  ;;  %vm401_vm8 = vcmask 1046534   ;;  %vm398_vm9 = vcmask 1045509  }
  0x4e   : > { %v437_v36 = vperm.slane %v406_v31, 1  ;;  %v349_v37 = vadd.f32 %v345_v34, %v333_v32  ;;  %v402_v38 = vsel %vm401_vm8, %v956_v21, %v968_v27  ;;  %v436_v39 = vperm.slane %v406_v31, 0 }
  0x4f   : > { %v403_v40 = vrot.slane %v402_v38, 6  ;;  %v399_v5 = vsel %vm398_vm9, %v956_v21, %v968_v27  ;;  %vm395_vm11 = vcmask 1044484   ;;  %vm389_vm12 = vcmask 1042434  }
  0x50   : > { %v517_v42 = vmul.f32 %v437_v36, %v983_v29  ;;  %v1010_v43 = vrot.slane %v349_v37, 7  ;;  %v515_v44 = vmul.f32 %v437_v36, %v979_v14  ;;  %v516_v45 = vmul.f32 %v436_v39, %v981_v24 }
  0x51   : > { %v435_v46 = vperm.slane %v403_v40, 1  ;;  %v400_v47 = vrot.slane %v399_v5, 5  ;;  %v514_v48 = vmul.f32 %v436_v39, %v977_v0  ;;  %v434_v49 = vperm.slane %v403_v40, 0 }
  0x52   : > { %597 = vmatpush.msra.mxu2 %v517_v42  ;;  %v420_v50 = vsel %vm404_vm10, %v1010_v43, %v1001_v35  ;;  %v418_v51 = vsel %vm401_vm8, %v1001_v35, %v1010_v43  ;;  %557 = vmatpush.msra.mxu0 %v516_v45  ;;  %v416_v52 = vsel %vm398_vm9, %v1001_v35, %v1010_v43  ;;  %vm392_vm10 = vcmask 1043459  }
  0x53   : > { %v421_v53 = vrot.slane %v420_v50, 7  ;;  %v513_v54 = vmul.f32 %v435_v46, %v983_v29  ;;  %v419_v55 = vrot.slane %v418_v51, 6  ;;  %v511_v56 = vmul.f32 %v435_v46, %v979_v14 }
  0x54   : > { %598 = vmatpush.msra.mxu2 %v515_v44  ;;  %v433_v57 = vperm.slane %v400_v47, 1  ;;  %v417_v58 = vrot.slane %v416_v52, 5  ;;  %558 = vmatpush.msra.mxu0 %v514_v48  ;;  %v512_v62 = vmul.f32 %v434_v49, %v981_v24  ;;  %v396_v63 = vsel %vm395_vm11, %v956_v21, %v968_v27 }
  0x55   : > { %v453_v1 = vperm.slane %v421_v53, 1  ;;  %v451_v2 = vperm.slane %v419_v55, 1  ;;  %v452_v7 = vperm.slane %v421_v53, 0  ;;  %v450_v11 = vperm.slane %v419_v55, 0 }
  0x56   : > { %599 = vmatpush.msra.mxu2 %v513_v54  ;;  %v509_v8 = vmul.f32 %v433_v57, %v983_v29  ;;  %559 = vmatpush.msra.mxu0 %v512_v62  ;;  %v397_v12 = vrot.slane %v396_v63, 4  ;;  %v449_v17 = vperm.slane %v417_v58, 1  ;;  %v507_v22 = vmul.f32 %v433_v57, %v979_v14 }
  0x57   : > { %v549_v15 = vmul.f32 %v453_v1, %v983_v29  ;;  %v547_v16 = vmul.f32 %v453_v1, %v979_v14  ;;  %v545_v18 = vmul.f32 %v451_v2, %v983_v29  ;;  %v548_v19 = vmul.f32 %v452_v7, %v981_v24 }
  0x58   : > { %600 = vmatpush.msra.mxu2 %v511_v56  ;;  %v546_v20 = vmul.f32 %v452_v7, %v977_v0  ;;  %v543_v60 = vmul.f32 %v451_v2, %v979_v14  ;;  %v431_v61 = vperm.slane %v397_v12, 1  ;;  %v414_v3 = vsel %vm395_vm11, %v1001_v35, %v1010_v43 }
  0x59   : > { %617 = vmatpush.msra.mxu3 %v549_v15  ;;  %v510_v4 = vmul.f32 %v434_v49, %v977_v0  ;;  %577 = vmatpush.msra.mxu1 %v548_v19  ;;  %v544_v9 = vmul.f32 %v450_v11, %v981_v24  ;;  %v415_v10 = vrot.slane %v414_v3, 4  ;;  %v432_v25 = vperm.slane %v400_v47, 0 }
  0x5a   : > { %601 = vmatpush.msra.mxu2 %v509_v8  ;;  %v448_v26 = vperm.slane %v417_v58, 0  ;;  %v505_v28 = vmul.f32 %v431_v61, %v983_v29  ;;  %v542_v6 = vmul.f32 %v450_v11, %v977_v0  ;;  %v393_v13 = vsel %vm392_vm10, %v956_v21, %v968_v27 }
  0x5b   : > { %618 = vmatpush.msra.mxu3 %v547_v16  ;;  %560 = vmatpush.msra.mxu0 %v510_v4  ;;  %v430_v23 = vperm.slane %v397_v12, 0  ;;  %v447_v59 = vperm.slane %v415_v10, 1  ;;  %v503_v30 = vmul.f32 %v431_v61, %v979_v14  ;;  %v508_v31 = vmul.f32 %v432_v25, %v981_v24 }
  0x5c   : > { %578 = vmatpush.msra.mxu1 %v546_v20  ;;  %602 = vmatpush.msra.mxu2 %v507_v22  ;;  %v394_v32 = vrot.slane %v393_v13, 3  ;;  %v541_v33 = vmul.f32 %v449_v17, %v983_v29  ;;  %v539_v34 = vmul.f32 %v449_v17, %v979_v14  ;;  %v412_v36 = vsel %vm392_vm10, %v1001_v35, %v1010_v43 }
  0x5d   : > { %619 = vmatpush.msra.mxu3 %v545_v18  ;;  %v506_v37 = vmul.f32 %v432_v25, %v977_v0  ;;  %v540_v38 = vmul.f32 %v448_v26, %v981_v24  ;;  %v413_v40 = vrot.slane %v412_v36, 3  ;;  %v538_v5 = vmul.f32 %v448_v26, %v977_v0  ;;  %561 = vmatpush.msra.mxu0 %v508_v31 }
  0x5e   : > { %579 = vmatpush.msra.mxu1 %v544_v9  ;;  %603 = vmatpush.msra.mxu2 %v505_v28  ;;  %v429_v39 = vperm.slane %v394_v32, 1  ;;  %v504_v41 = vmul.f32 %v430_v23, %v981_v24  ;;  %v446_v42 = vperm.slane %v415_v10, 0  ;;  %v390_v44 = vsel %vm389_vm12, %v956_v21, %v968_v27 }
  0x5f   : > { %620 = vmatpush.msra.mxu3 %v543_v60  ;;  %v410_v45 = vsel %vm389_vm12, %v1001_v35, %v1010_v43  ;;  %v537_v46 = vmul.f32 %v447_v59, %v983_v29  ;;  %v391_v49 = vrot.slane %v390_v44, 2  ;;  %v445_v50 = vperm.slane %v413_v40, 1  ;;  %562 = vmatpush.msra.mxu0 %v506_v37 }
  0x60   : > { %580 = vmatpush.msra.mxu1 %v542_v6  ;;  %604 = vmatpush.msra.mxu2 %v503_v30  ;;  %v501_v47 = vmul.f32 %v429_v39, %v983_v29  ;;  %v499_v48 = vmul.f32 %v429_v39, %v979_v14  ;;  %v411_v51 = vrot.slane %v410_v45, 2  ;;  %v502_v52 = vmul.f32 %v430_v23, %v977_v0  ;;  %v553_v39 = vld.sshfl [vmem:[#allocation1] sm:$0xff pattern:$0x75316420] }
  0x61   : > { %621 = vmatpush.msra.mxu3 %v541_v33  ;;  %v428_v53 = vperm.slane %v394_v32, 0  ;;  %v536_v54 = vmul.f32 %v446_v42, %v981_v24  ;;  %v427_v55 = vperm.slane %v391_v49, 1  ;;  %v444_v56 = vperm.slane %v413_v40, 0  ;;  %563 = vmatpush.msra.mxu0 %v504_v41 }
  0x62   : > { %581 = vmatpush.msra.mxu1 %v540_v38  ;;  %605 = vmatpush.msra.mxu2 %v501_v47  ;;  %v535_v57 = vmul.f32 %v447_v59, %v979_v14  ;;  %v443_v58 = vperm.slane %v411_v51, 1  ;;  %vm386_vm13 = vcmask 1041409   ;;  %v534_v1 = vmul.f32 %v446_v42, %v977_v0  ;;  %v554_v47 = vld.sshfl [vmem:[#allocation1 + $0x8] sm:$0xff pattern:$0x75316420] }
  0x63   : > { %622 = vmatpush.msra.mxu3 %v539_v34  ;;  %v500_v62 = vmul.f32 %v428_v53, %v981_v24  ;;  %v497_v63 = vmul.f32 %v427_v55, %v983_v29  ;;  %v495_v2 = vmul.f32 %v427_v55, %v979_v14  ;;  %v426_v7 = vperm.slane %v391_v49, 0  ;;  %564 = vmatpush.msra.mxu0 %v502_v52 }
  0x64   : > { %582 = vmatpush.msra.mxu1 %v538_v5  ;;  %606 = vmatpush.msra.mxu2 %v499_v48  ;;  %v533_v8 = vmul.f32 %v445_v50, %v983_v29  ;;  %v387_v11 = vsel %vm386_vm13, %v956_v21, %v968_v27  ;;  %v498_v12 = vmul.f32 %v428_v53, %v977_v0  ;;  %v442_v15 = vperm.slane %v411_v51, 0 }
  0x65   : > { %623 = vmatpush.msra.mxu3 %v537_v46  ;;  %v531_v16 = vmul.f32 %v445_v50, %v979_v14  ;;  %v532_v17 = vmul.f32 %v444_v56, %v981_v24  ;;  %v388_v18 = vrot.slane %v387_v11, 1  ;;  %v408_v19 = vsel %vm386_vm13, %v1001_v35, %v1010_v43  ;;  %565 = vmatpush.msra.mxu0 %v500_v62 }
  0x66   : > { %583 = vmatpush.msra.mxu1 %v536_v54  ;;  %607 = vmatpush.msra.mxu2 %v497_v63  ;;  %v529_v20 = vmul.f32 %v443_v58, %v983_v29  ;;  %v409_v22 = vrot.slane %v408_v19, 1  ;;  %v496_v60 = vmul.f32 %v426_v7, %v981_v24  ;;  %vm384_vm14 = vcmask 1040384  }
  0x67   : > { %624 = vmatpush.msra.mxu3 %v535_v57  ;;  %v425_v61 = vperm.slane %v388_v18, 1  ;;  %v530_v3 = vmul.f32 %v444_v56, %v977_v0  ;;  %v528_v4 = vmul.f32 %v442_v15, %v981_v24  ;;  %v385_v9 = vsel %vm384_vm14, %v956_v21, %v968_v27  ;;  %566 = vmatpush.msra.mxu0 %v498_v12 }
  0x68   : > { %584 = vmatpush.msra.mxu1 %v534_v1  ;;  %608 = vmatpush.msra.mxu2 %v495_v2  ;;  %v441_v10 = vperm.slane %v409_v22, 1  ;;  %v423_v25 = vperm.slane %v385_v9, 1  ;;  %v494_v26 = vmul.f32 %v426_v7, %v977_v0  ;;  %v424_v28 = vperm.slane %v388_v18, 0 }
  0x69   : > { %625 = vmatpush.msra.mxu3 %v533_v8  ;;  %v493_v6 = vmul.f32 %v425_v61, %v983_v29  ;;  %v491_v13 = vmul.f32 %v425_v61, %v979_v14  ;;  %v407_v23 = vsel %vm384_vm14, %v1001_v35, %v1010_v43  ;;  %v440_v59 = vperm.slane %v409_v22, 0  ;;  %567 = vmatpush.msra.mxu0 %v496_v60 }
  0x6a   : > { %585 = vmatpush.msra.mxu1 %v532_v17  ;;  %v527_v21 = vmul.f32 %v443_v58, %v979_v14  ;;  %v489_v27 = vmul.f32 %v423_v25, %v983_v29  ;;  %v526_v30 = vmul.f32 %v442_v15, %v977_v0  ;;  %v422_v31 = vperm.slane %v385_v9, 0 }
  0x6b   : > { %626 = vmatpush.msra.mxu3 %v531_v16  ;;  %609 = vmatpush.msra.mxu2 %v493_v6  ;;  %v525_v32 = vmul.f32 %v441_v10, %v983_v29  ;;  %v439_v33 = vperm.slane %v407_v23, 1  ;;  %v492_v34 = vmul.f32 %v424_v28, %v981_v24  ;;  %v490_v35 = vmul.f32 %v424_v28, %v977_v0 }
  0x6c   : > { %586 = vmatpush.msra.mxu1 %v530_v3  ;;  %568 = vmatpush.msra.mxu0 %v494_v26  ;;  %v487_v43 = vmul.f32 %v423_v25, %v979_v14  ;;  %v524_v36 = vmul.f32 %v440_v59, %v981_v24  ;;  %v438_v37 = vperm.slane %v407_v23, 0  ;;  %v523_v38 = vmul.f32 %v441_v10, %v979_v14 }
  0x6d   : > { %627 = vmatpush.msra.mxu3 %v529_v20  ;;  %610 = vmatpush.msra.mxu2 %v491_v13  ;;  %v522_v40 = vmul.f32 %v440_v59, %v977_v0  ;;  %v488_v5 = vmul.f32 %v422_v31, %v981_v24  ;;  %v521_v41 = vmul.f32 %v439_v33, %v983_v29  ;;  %vm640_vm15 = vcmask 1043456  }
  0x6e   : > { %587 = vmatpush.msra.mxu1 %v528_v4  ;;  %569 = vmatpush.msra.mxu0 %v492_v34  ;;  %v520_v42 = vmul.f32 %v438_v37, %v981_v24  ;;  %v486_v44 = vmul.f32 %v422_v31, %v977_v0  ;;  %v519_v45 = vmul.f32 %v439_v33, %v979_v14 }
  0x6f   : > { %628 = vmatpush.msra.mxu3 %v527_v21  ;;  %611 = vmatpush.msra.mxu2 %v489_v27  ;;  %v518_v46 = vmul.f32 %v438_v37, %v977_v0 }
  0x70   : > { %588 = vmatpush.msra.mxu1 %v526_v30  ;;  %570 = vmatpush.msra.mxu0 %v490_v35 }
  0x71   : > { %629 = vmatpush.msra.mxu3 %v525_v32  ;;  %612 = vmatpush.msra.mxu2 %v487_v43 }
  0x72   : > { %589 = vmatpush.msra.mxu1 %v524_v36  ;;  %613 = vmatmul.f32.vlgmr.msra.gmra.mxu2 %v553_v39 }
  0x73   : > { %630 = vmatpush.msra.mxu3 %v523_v38  ;;  %571 = vmatpush.msra.mxu0 %v488_v5 }
  0x74   : > { %590 = vmatpush.msra.mxu1 %v522_v40 }
  0x75   : > { %631 = vmatpush.msra.mxu3 %v521_v41  ;;  %572 = vmatpush.msra.mxu0 %v486_v44 }
  0x76   : > { %591 = vmatpush.msra.mxu1 %v520_v42  ;;  %573 = vmatmul.f32.vlgmr.msra.gmra.mxu0 %v553_v39 }
  0x77   : > { %632 = vmatpush.msra.mxu3 %v519_v45 }
  0x78   : > { %633 = vmatmul.f32.vlgmr.msra.gmra.mxu3 %v554_v47  ;;  %592 = vmatpush.msra.mxu1 %v518_v46 }
  0x79   : > { %593 = vmatmul.f32.vlgmr.msra.gmra.mxu1 %v554_v47 }
  0xf3   : > { %v574_v24 = vpop.f32.mrf.mxu0 }
  0xf5   : > { %v614_v29 = vpop.f32.mrf.mxu2 }
  0xf6   : > { %v594_v48 = vpop.f32.mrf.mxu1 }
  0xf7   : > { %v595_v50 = vadd.f32 %v594_v48, %v574_v24 }
  0xfb   : > { %v634_v49 = vpop.f32.mrf.mxu3 }
  0xfc   : > { %v635_v14 = vadd.f32 %v634_v49, %v614_v29 }
  0xfe   : > { %v639_v51 = vrot.slane %v635_v14, 4 }
 0x100   : > { %v641_v0 = vsel %vm640_vm15, %v595_v50, %v639_v51 }
 0x101   : > { %643 = vst [vmem:[%s201_s23] sm:$0xff] %v641_v0 }
 0x102 PF: > { %s12_s11 = sadd.s32 1, %s846_s11   ;;  %s1131_s9 = smov %s842_s10 }
 0x103   : > { %p9_p5 = scmp.ge.s32.totalorder %s12_s11, 4   ;;  %s1132_s10 = smov %s1134_s12 }
 0x105   :  { %11 = sbr.rel (!%p9_p5) target bundleno = 2 (0x2), region = 61 }

</bundles_post_ra>
